<compile_context>
chip_gen: v6e
topology: v6e:2x2x1
jax: 0.10.0
libtpu: 0.0.40
codegen_flags: <defaults>
</compile_context>

<pallas_src>
import functools

import jax
import jax.numpy as jnp
from jax import lax
from jax.experimental import pallas as pl
from jax.experimental.pallas import tpu as pltpu


_LANE = 128
_SUBLANE = 8
_STREAM_BUDGET = 16 * 1024 * 1024        # conservative working-set target / call
_STREAM_VMEM_LIMIT = 32 * 1024 * 1024    # scoped VMEM limit (safe on every gen)
_FUSED_TILE_BUDGET = 4 * 1024 * 1024     # per-tile budget inside the fused path
_MIN_GRID_STEPS = 8                      # pipelining + v7x megacore sharding


def _cdiv(a, b):
    return -(-a // b)


def _round_up(a, m):
    return _cdiv(a, m) * m


def _vmem_capacity_bytes():
    # Physical VMEM per TensorCore: 128 MiB on v5e/v6e, 64 MiB on v7x.
    default = 64 * 1024 * 1024           # smallest across generations
    try:
        cap = getattr(pltpu.get_tpu_info(), "vmem_capacity_bytes", None)
        return int(cap) if cap else default
    except Exception:
        return default


def _apply_activation(y, activation, act_param):
    if activation == "leaky_relu":
        return jnp.where(y >= 0, y, y * act_param)
    if activation == "relu":
        return jnp.maximum(y, 0.0)
    if activation == "elu":
        return jnp.where(y >= 0, y, act_param * (jnp.exp(y) - 1.0))
    if activation == "identity":
        return y
    raise ValueError(f"Unknown activation {activation}")


# ---------------------------------------------------------------------------
# Tiling for the streaming path.  `work_bytes_per_elem` covers the
# double-buffered input/output block bytes plus f32 intermediates so the
# *physical* (lane-padded) working set stays under `budget_bytes`.
# ---------------------------------------------------------------------------
def _choose_tiles(rows, lanes, work_bytes_per_elem, *,
                  budget_bytes=_STREAM_BUDGET, min_steps=_MIN_GRID_STEPS):
    lanes_p = _round_up(lanes, _LANE)
    if lanes_p <= 32768:
        tl, tlp = lanes, lanes_p         # full lane extent: always a legal block
    else:
        tl = tlp = 16384                 # 128-multiple chunks; caller masks tails
    lane_steps = _cdiv(lanes, tl)

    per_row = tlp * work_bytes_per_elem
    max_rows = max(_SUBLANE, (budget_bytes // max(per_row, 1)) // _SUBLANE * _SUBLANE)

    # Enough total grid steps for DMA/compute overlap and megacore sharding.
    want_row_steps = max(1, _cdiv(min_steps, lane_steps))
    row_cap = _round_up(max(_cdiv(rows, want_row_steps), 1), _SUBLANE)

    tr = min(max_rows, row_cap)
    if rows < tr:
        tr = rows                        # tiny inputs: full-extent row block
    return int(tr), int(tl)


# ---------------------------------------------------------------------------
# Streaming pass 1: per-row (= per (n, c)) sum and sum-of-squares, reduced
# along the lane (spatial) axis and accumulated across lane tiles.
# ---------------------------------------------------------------------------
def _stats_kernel(x_ref, sum_ref, sumsq_ref, *, lanes, lane_tile, mask_lanes):
    j = pl.program_id(1)

    @pl.when(j == 0)
    def _():
        sum_ref[...] = jnp.zeros_like(sum_ref)
        sumsq_ref[...] = jnp.zeros_like(sumsq_ref)

    x = x_ref[...].astype(jnp.float32)
    if mask_lanes:                       # static: only when lane_tile !| lanes
        lane = lax.broadcasted_iota(jnp.int32, x.shape, 1)
        x = jnp.where(j * lane_tile + lane < lanes, x, 0.0)
    sum_ref[...] += jnp.sum(x, axis=1, keepdims=True)
    sumsq_ref[...] += jnp.sum(x * x, axis=1, keepdims=True)


# ---------------------------------------------------------------------------
# Streaming pass 2: y = act(x * scale + shift).  `scale`/`shift` blocks are
# either (tr, 1) per-row or (1, tl) per-element vectors; the body broadcasts
# either way.
# ---------------------------------------------------------------------------
def _norm_act_kernel(x_ref, scale_ref, shift_ref, o_ref, *, activation, act_param):
    x = x_ref[...].astype(jnp.float32)
    y = x * scale_ref[...] + shift_ref[...]
    o_ref[...] = _apply_activation(y, activation, act_param).astype(o_ref.dtype)


def _abn_two_pass(x_nchw, gamma, beta, *, eps, activation, act_param):
    N, C, H, W = x_nchw.shape
    L = H * W
    R = N * C
    M = N * L
    itemsize = x_nchw.dtype.itemsize

    # --- pass 1: per-(n, c) sums over the spatial axis ----------------------
    x_rows = x_nchw.reshape(R, L)                    # contiguous view: free
    tr1, tl1 = _choose_tiles(R, L, 2 * itemsize + 12)
    grid1 = (_cdiv(R, tr1), _cdiv(L, tl1))
    mask_lanes = (L % tl1) != 0

    row_sum, row_sumsq = pl.pallas_call(
        functools.partial(_stats_kernel, lanes=L, lane_tile=tl1,
                          mask_lanes=mask_lanes),
        out_shape=(jax.ShapeDtypeStruct((R, 1), jnp.float32),
                   jax.ShapeDtypeStruct((R, 1), jnp.float32)),
        grid_spec=pltpu.PrefetchScalarGridSpec(
            num_scalar_prefetch=0,
            grid=grid1,
            in_specs=[pl.BlockSpec((tr1, tl1), lambda i, j: (i, j))],
            out_specs=(pl.BlockSpec((tr1, 1), lambda i, j: (i, 0)),
                       pl.BlockSpec((tr1, 1), lambda i, j: (i, 0)))),
        compiler_params=pltpu.CompilerParams(
            dimension_semantics=("parallel", "arbitrary"),
            vmem_limit_bytes=_STREAM_VMEM_LIMIT),
    )(x_rows)

    # --- tiny per-channel math (C elements, plain JAX) ----------------------
    # TODO(synk): fold this glue into a pass-1 epilogue for latency-bound nets.
    ch_sum = row_sum.reshape(N, C).sum(axis=0)
    ch_sumsq = row_sumsq.reshape(N, C).sum(axis=0)
    mean = ch_sum / M
    # TODO(synk): E[x^2]-E[x]^2 cancels when |mean| >> std; the fused path
    # below uses a centered second accumulation instead.
    var = jnp.maximum(ch_sumsq / M - mean * mean, 0.0)
    scale_c = gamma * lax.rsqrt(var + eps)
    shift_c = beta - mean * scale_c

    # --- pass 2: lane-dense normalize + affine + activation -----------------
    if L % _LANE == 0:
        # (N*C, H*W) view: spatial on lanes, per-row (R, 1) scale/shift.
        rows2, lanes2 = R, L
        x2 = x_rows
        scale_v = jnp.broadcast_to(scale_c[None, :], (N, C)).reshape(R, 1)
        shift_v = jnp.broadcast_to(shift_c[None, :], (N, C)).reshape(R, 1)
        tr2, tl2 = _choose_tiles(rows2, lanes2, 4 * itemsize + 8)
        grid2 = (_cdiv(rows2, tr2), _cdiv(lanes2, tl2))
        in_specs = [pl.BlockSpec((tr2, tl2), lambda i, j: (i, j)),
                    pl.BlockSpec((tr2, 1), lambda i, j: (i, 0)),
                    pl.BlockSpec((tr2, 1), lambda i, j: (i, 0))]
        out_spec = pl.BlockSpec((tr2, tl2), lambda i, j: (i, j))
    else:
        # (N, C*H*W) view: lane-dense stores even for tiny spatial maps.
        # scale/shift become per-element (1, C*L) vectors (tiny, reused).
        rows2, lanes2 = N, C * L
        x2 = x_nchw.reshape(N, C * L)
        scale_v = jnp.repeat(scale_c, L).reshape(1, C * L)
        shift_v = jnp.repeat(shift_c, L).reshape(1, C * L)
        tr2, tl2 = _choose_tiles(rows2, lanes2, 4 * itemsize + 8)
        # Rows iterate fastest so the (1, tl2) scale/shift blocks are fetched
        # once per lane tile, not once per (row, lane) tile.
        grid2 = (_cdiv(lanes2, tl2), _cdiv(rows2, tr2))
        in_specs = [pl.BlockSpec((tr2, tl2), lambda j, i: (i, j)),
                    pl.BlockSpec((1, tl2), lambda j, i: (0, j)),
                    pl.BlockSpec((1, tl2), lambda j, i: (0, j))]
        out_spec = pl.BlockSpec((tr2, tl2), lambda j, i: (i, j))

    y2 = pl.pallas_call(
        functools.partial(_norm_act_kernel, activation=activation,
                          act_param=act_param),
        out_shape=jax.ShapeDtypeStruct((rows2, lanes2), x_nchw.dtype),
        grid_spec=pltpu.PrefetchScalarGridSpec(
            num_scalar_prefetch=0,
            grid=grid2,
            in_specs=in_specs,
            out_specs=out_spec),
        compiler_params=pltpu.CompilerParams(
            dimension_semantics=("parallel", "parallel"),
            vmem_limit_bytes=_STREAM_VMEM_LIMIT),
    )(x2, scale_v, shift_v)

    return y2.reshape(N, C, H, W), mean, var


# ---------------------------------------------------------------------------
# Fused VMEM-resident path.  Grid = (phase, row_tile over N), sequential.
#   phase 0: stream x in, copy into VMEM scratch, accumulate per-channel sum
#   phase 1: centered sum of squares from the resident copy (no HBM traffic)
#   phase 2: finalize scale/shift once, normalize + activate, stream y out
# x is read from HBM once and y written once (2x traffic vs 3x).
# ---------------------------------------------------------------------------
def _plan_fused(N, C, L, itemsize, capacity):
    Cp = _round_up(C, _SUBLANE)
    Lp = _round_up(L, _LANE)
    plane = Cp * Lp * itemsize                       # one padded (1, C, L) slab
    bn = max(1, min(_cdiv(N, _MIN_GRID_STEPS),
                    _FUSED_TILE_BUDGET // max(plane, 1)))
    bn = min(bn, N)
    n_tiles = _cdiv(N, bn)
    scratch = n_tiles * bn * plane                   # resident copy of x
    tile_in = bn * plane
    tile_f32 = bn * Cp * Lp * 4
    need = scratch + 4 * tile_in + 3 * tile_f32 + (1 << 20)
    if need > capacity // 2:                         # leave headroom, else stream
        return None
    vmem_limit = int(min(capacity * 3 // 4, max(need + (8 << 20), 32 << 20)))
    return {"bn": bn, "n_tiles": n_tiles, "vmem_limit": vmem_limit}


def _fused_kernel(x_ref, gamma_ref, beta_ref, y_ref, mean_ref, var_ref,
                  xcopy_ref, sum_ref, varsum_ref, scale_ref, shift_ref,
                  *, bn, n_valid, inv_m, eps, activation, act_param, mask_rows):
    p = pl.program_id(0)
    i = pl.program_id(1)
    row0 = i * bn

    def row_mask(shape):
        r = lax.broadcasted_iota(jnp.int32, shape, 0)
        return (row0 + r) < n_valid

    def reduce_nc(v):  # (bn, C, L) -> (1, C, 1)
        return jnp.sum(jnp.sum(v, axis=2, keepdims=True), axis=0, keepdims=True)

    # -- phase 0: copy tile into the resident scratch, accumulate sums -------
    @pl.when(p == 0)
    def _():
        @pl.when(i == 0)
        def _():
            sum_ref[...] = jnp.zeros_like(sum_ref)
            varsum_ref[...] = jnp.zeros_like(varsum_ref)

        xt = x_ref[...]
        xcopy_ref[pl.ds(row0, bn), :, :] = xt
        xf = xt.astype(jnp.float32)
        if mask_rows:
            xf = jnp.where(row_mask(xf.shape), xf, 0.0)
        sum_ref[...] += reduce_nc(xf)

    # -- phase 1: centered sum of squares from the resident copy -------------
    @pl.when(p == 1)
    def _():
        mean = sum_ref[...] * inv_m
        xf = xcopy_ref[pl.ds(row0, bn), :, :].astype(jnp.float32)
        d = xf - mean
        if mask_rows:
            d = jnp.where(row_mask(d.shape), d, 0.0)
        varsum_ref[...] += reduce_nc(d * d)

    # -- phase 2: finalize stats once, normalize + activate + write ----------
    @pl.when(p == 2)
    def _():
        @pl.when(i == 0)
        def _():
            mean = sum_ref[...] * inv_m
            var = varsum_ref[...] * inv_m
            sc = gamma_ref[...] * lax.rsqrt(var + eps)
            scale_ref[...] = sc
            shift_ref[...] = beta_ref[...] - mean * sc
            mean_ref[...] = mean
            var_ref[...] = var

        xf = xcopy_ref[pl.ds(row0, bn), :, :].astype(jnp.float32)
        y = xf * scale_ref[...] + shift_ref[...]
        y_ref[...] = _apply_activation(y, activation, act_param).astype(y_ref.dtype)


def _abn_fused(x3d, gamma, beta, *, eps, activation, act_param, plan):
    N, C, L = x3d.shape
    bn, n_tiles = plan["bn"], plan["n_tiles"]
    M = N * L
    last = n_tiles - 1
    mask_rows = (N % bn) != 0
    g3 = gamma.reshape(1, C, 1).astype(jnp.float32)
    b3 = beta.reshape(1, C, 1).astype(jnp.float32)

    kernel = functools.partial(
        _fused_kernel, bn=bn, n_valid=N, inv_m=1.0 / M, eps=float(eps),
        activation=activation, act_param=act_param, mask_rows=mask_rows)

    y, mean3, var3 = pl.pallas_call(
        kernel,
        out_shape=(jax.ShapeDtypeStruct((N, C, L), x3d.dtype),
                   jax.ShapeDtypeStruct((1, C, 1), jnp.float32),
                   jax.ShapeDtypeStruct((1, C, 1), jnp.float32)),
        grid_spec=pltpu.PrefetchScalarGridSpec(
            num_scalar_prefetch=0,
            grid=(3, n_tiles),
            in_specs=[
                # x is fetched only during phase 0 (index frozen afterwards).
                pl.BlockSpec((bn, C, L),
                             lambda p, i: (jnp.where(p == 0, i, last), 0, 0)),
                pl.BlockSpec((1, C, 1), lambda p, i: (0, 0, 0)),
                pl.BlockSpec((1, C, 1), lambda p, i: (0, 0, 0)),
            ],
            out_specs=(
                # y blocks only advance during phase 2, so each block is
                # written exactly once before it is flushed to HBM.
                pl.BlockSpec((bn, C, L),
                             lambda p, i: (jnp.where(p == 2, i, 0), 0, 0)),
                pl.BlockSpec((1, C, 1), lambda p, i: (0, 0, 0)),
                pl.BlockSpec((1, C, 1), lambda p, i: (0, 0, 0)),
            ),
            scratch_shapes=[
                pltpu.VMEM((n_tiles * bn, C, L), x3d.dtype),   # resident x copy
                pltpu.VMEM((1, C, 1), jnp.float32),            # channel sum
                pltpu.VMEM((1, C, 1), jnp.float32),            # centered sumsq
                pltpu.VMEM((1, C, 1), jnp.float32),            # scale
                pltpu.VMEM((1, C, 1), jnp.float32),            # shift
            ]),
        compiler_params=pltpu.CompilerParams(
            dimension_semantics=("arbitrary", "arbitrary"),
            vmem_limit_bytes=plan["vmem_limit"]),
    )(x3d, g3, b3)

    return y, mean3.reshape(C), var3.reshape(C)


# ---------------------------------------------------------------------------
# Public entry point: training-mode ABN forward.
# Returns (y_nchw, new_running_mean, new_running_var).
# ---------------------------------------------------------------------------
def abn_forward(x_nchw, weight, bias, running_mean, running_var, *,
                eps=1e-5, momentum=0.1, activation="leaky_relu",
                activation_param=0.01, force_two_pass=False):
    N, C, H, W = x_nchw.shape
    L = H * W
    M = N * L

    gamma = (weight if weight is not None
             else jnp.ones((C,), jnp.float32)).astype(jnp.float32)
    beta = (bias if bias is not None
            else jnp.zeros((C,), jnp.float32)).astype(jnp.float32)

    plan = None
    if not force_two_pass:
        plan = _plan_fused(N, C, L, x_nchw.dtype.itemsize, _vmem_capacity_bytes())

    if plan is not None:
        y3, mean, var = _abn_fused(
            x_nchw.reshape(N, C, L), gamma, beta, eps=eps,
            activation=activation, act_param=float(activation_param), plan=plan)
        y = y3.reshape(N, C, H, W)
    else:
        y, mean, var = _abn_two_pass(
            x_nchw, gamma, beta, eps=eps, activation=activation,
            act_param=float(activation_param))

    # Running-stat EMA side effect (PyTorch training mode: unbiased variance).
    bessel = M / max(M - 1, 1)
    var_unbiased = var * bessel
    new_rm = (1.0 - momentum) * running_mean + momentum * mean
    new_rv = (1.0 - momentum) * running_var + momentum * var_unbiased
    return y, new_rm, new_rv


# ---------------------------------------------------------------------------
# Pure-JAX reference of training-mode batch_norm + activation (NCHW).
# ---------------------------------------------------------------------------
def _abn_reference(x, weight, bias, eps=1e-5, activation="leaky_relu",
                   activation_param=0.01):
    mean = jnp.mean(x, axis=(0, 2, 3), keepdims=True)
    var = jnp.mean(jnp.square(x - mean), axis=(0, 2, 3), keepdims=True)
    y = (x - mean) * lax.rsqrt(var + eps)
    y = y * weight.reshape(1, -1, 1, 1) + bias.reshape(1, -1, 1, 1)
    if activation == "leaky_relu":
        return jnp.where(y >= 0, y, y * activation_param)
    if activation == "relu":
        return jnp.maximum(y, 0.0)
    if activation == "elu":
        return jnp.where(y >= 0, y, activation_param * (jnp.exp(y) - 1.0))
    return y


if __name__ == "__main__":
    def check(name, shape, *, weight_val=1.0, bias_val=0.0,
              activation="leaky_relu", activation_param=0.01,
              force_two_pass=False, seed=0, check_stats=False):
        N, C, H, W = shape
        x = jax.random.normal(jax.random.PRNGKey(seed), shape,
                              dtype=jnp.float32) * 2.0 + 0.5
        w = jnp.full((C,), weight_val, jnp.float32)
        b = jnp.full((C,), bias_val, jnp.float32)
        rm = jnp.zeros((C,), jnp.float32)
        rv = jnp.ones((C,), jnp.float32)

        y, nrm, nrv = abn_forward(
            x, w, b, rm, rv, eps=1e-5, momentum=0.1, activation=activation,
            activation_param=activation_param, force_two_pass=force_two_pass)
        jax.block_until_ready((y, nrm, nrv))

        y_ref = _abn_reference(x, w, b, activation=activation,
                               activation_param=activation_param)
        assert jnp.allclose(y, y_ref, atol=1e-3, rtol=1e-3), f"{name}: output mismatch"
        if check_stats:
            mean_ref = jnp.mean(x, axis=(0, 2, 3))
            var_ref = jnp.var(x, axis=(0, 2, 3), ddof=1)
            rm_ref = 0.9 * rm + 0.1 * mean_ref
            rv_ref = 0.9 * rv + 0.1 * var_ref
            assert jnp.allclose(nrm, rm_ref, atol=1e-3, rtol=1e-3), \
                f"{name}: running_mean mismatch"
            assert jnp.allclose(nrv, rv_ref, atol=1e-3, rtol=1e-3), \
                f"{name}: running_var mismatch"

    # Fused (VMEM-resident) path: default for small layers.
    check("fused_base", (2, 4, 16, 16), check_stats=True)
    check("fused_ragged_spatial", (1, 8, 12, 15), weight_val=1.5, bias_val=-0.25,
          seed=1)
    check("fused_row_tail_elu", (11, 3, 8, 16), activation="elu",
          activation_param=1.0, check_stats=True, seed=2)

    # Streaming two-pass path (forced) with both pass-2 layouts and tails.
    check("stream_lane_dense", (2, 4, 16, 16), force_two_pass=True,
          check_stats=True)
    check("stream_small_spatial", (3, 5, 9, 14), weight_val=0.75, bias_val=0.3,
          force_two_pass=True, seed=3)
    check("stream_lane_tiled", (1, 2, 200, 200), force_two_pass=True, seed=4)

    print("KERNEL_OK")
</pallas_src>

<mosaic_0001>
module attributes {stable_mosaic.version = 11 : i64} {
  func.func @_fused_kernel(%arg0: i32, %arg1: i32, %arg2: memref<1x4x256xf32, #tpu.memory_space<vmem>>, %arg3: memref<1x4x1xf32, #tpu.memory_space<vmem>>, %arg4: memref<1x4x1xf32, #tpu.memory_space<vmem>>, %arg5: memref<1x4x256xf32, #tpu.memory_space<vmem>>, %arg6: memref<1x4x1xf32, #tpu.memory_space<vmem>>, %arg7: memref<1x4x1xf32, #tpu.memory_space<vmem>>, %arg8: memref<2x4x256xf32, #tpu.memory_space<vmem>>, %arg9: memref<1x4x1xf32, #tpu.memory_space<vmem>>, %arg10: memref<1x4x1xf32, #tpu.memory_space<vmem>>, %arg11: memref<1x4x1xf32, #tpu.memory_space<vmem>>, %arg12: memref<1x4x1xf32, #tpu.memory_space<vmem>>) attributes {dimension_semantics = [#tpu.dimension_semantics<arbitrary>, #tpu.dimension_semantics<arbitrary>], iteration_bounds = array<i64: 3, 2>, scalar_prefetch = 0 : i64, scratch_operands = 5 : i64, tpu.core_type = #tpu.core_type<tc>, window_params = [{transform_indices = @transform_0, window_bounds = array<i64: 1, 4, 256>}, {pipeline_mode = #tpu.pipeline_mode<synchronous>, transform_indices = @transform_1, window_bounds = array<i64: 1, 4, 1>}, {pipeline_mode = #tpu.pipeline_mode<synchronous>, transform_indices = @transform_2, window_bounds = array<i64: 1, 4, 1>}, {transform_indices = @transform_3, window_bounds = array<i64: 1, 4, 256>}, {pipeline_mode = #tpu.pipeline_mode<synchronous>, transform_indices = @transform_4, window_bounds = array<i64: 1, 4, 1>}, {pipeline_mode = #tpu.pipeline_mode<synchronous>, transform_indices = @transform_5, window_bounds = array<i64: 1, 4, 1>}]} {
    %c1_i32 = arith.constant 1 : i32
    %0 = arith.muli %arg1, %c1_i32 : i32
    %c0_i32 = arith.constant 0 : i32
    %1 = arith.cmpi eq, %arg0, %c0_i32 : i32
    %2 = arith.extui %1 : i1 to i32
    %c0_i32_0 = arith.constant 0 : i32
    %3 = arith.cmpi ne, %2, %c0_i32_0 : i32
    scf.if %3 {
      %c0_i32_4 = arith.constant 0 : i32
      %10 = arith.cmpi eq, %arg1, %c0_i32_4 : i32
      %11 = arith.extui %10 : i1 to i32
      %c0_i32_5 = arith.constant 0 : i32
      %12 = arith.cmpi ne, %11, %c0_i32_5 : i32
      scf.if %12 {
        %cst_17 = arith.constant 0.000000e+00 : f32
        %23 = vector.broadcast %cst_17 : f32 to vector<1x4x1xf32>
        %c0_18 = arith.constant 0 : index
        %c0_19 = arith.constant 0 : index
        %c0_20 = arith.constant 0 : index
        %24 = vector.load %arg9[%c0_18, %c0_19, %c0_20] : memref<1x4x1xf32, #tpu.memory_space<vmem>>, vector<1x4x1xf32>
        tpu.vector_store %arg9[%c0_18, %c0_19, %c0_20], %23 {strides = array<i32>} : memref<1x4x1xf32, #tpu.memory_space<vmem>>, vector<1x4x1xf32>,
        %cst_21 = arith.constant 0.000000e+00 : f32
        %25 = vector.broadcast %cst_21 : f32 to vector<1x4x1xf32>
        %c0_22 = arith.constant 0 : index
        %c0_23 = arith.constant 0 : index
        %c0_24 = arith.constant 0 : index
        %26 = vector.load %arg10[%c0_22, %c0_23, %c0_24] : memref<1x4x1xf32, #tpu.memory_space<vmem>>, vector<1x4x1xf32>
        tpu.vector_store %arg10[%c0_22, %c0_23, %c0_24], %25 {strides = array<i32>} : memref<1x4x1xf32, #tpu.memory_space<vmem>>, vector<1x4x1xf32>,
      } else {
      }
      %c0 = arith.constant 0 : index
      %c0_6 = arith.constant 0 : index
      %c0_7 = arith.constant 0 : index
      %13 = vector.load %arg2[%c0, %c0_6, %c0_7] : memref<1x4x256xf32, #tpu.memory_space<vmem>>, vector<1x4x256xf32>
      %14 = arith.index_cast %0 : i32 to index
      %c0_8 = arith.constant 0 : index
      %c0_9 = arith.constant 0 : index
      %15 = vector.load %arg8[%14, %c0_8, %c0_9] : memref<2x4x256xf32, #tpu.memory_space<vmem>>, vector<1x4x256xf32>
      tpu.vector_store %arg8[%14, %c0_8, %c0_9], %13 {strides = array<i32>} : memref<2x4x256xf32, #tpu.memory_space<vmem>>, vector<1x4x256xf32>,
      %c0_10 = arith.constant 0 : index
      %c0_11 = arith.constant 0 : index
      %c0_12 = arith.constant 0 : index
      %16 = vector.load %arg9[%c0_10, %c0_11, %c0_12] : memref<1x4x1xf32, #tpu.memory_space<vmem>>, vector<1x4x1xf32>
      %cst = arith.constant dense<0.000000e+00> : vector<1x4xf32>
      %17 = vector.multi_reduction <add>, %13, %cst [2] : vector<1x4x256xf32> to vector<1x4xf32>
      %18 = vector.shape_cast %17 : vector<1x4xf32> to vector<1x4x1xf32>
      %cst_13 = arith.constant dense<0.000000e+00> : vector<4x1xf32>
      %19 = vector.multi_reduction <add>, %18, %cst_13 [0] : vector<1x4x1xf32> to vector<4x1xf32>
      %20 = vector.shape_cast %19 : vector<4x1xf32> to vector<1x4x1xf32>
      %21 = arith.addf %16, %20 : vector<1x4x1xf32>
      %c0_14 = arith.constant 0 : index
      %c0_15 = arith.constant 0 : index
      %c0_16 = arith.constant 0 : index
      %22 = vector.load %arg9[%c0_14, %c0_15, %c0_16] : memref<1x4x1xf32, #tpu.memory_space<vmem>>, vector<1x4x1xf32>
      tpu.vector_store %arg9[%c0_14, %c0_15, %c0_16], %21 {strides = array<i32>} : memref<1x4x1xf32, #tpu.memory_space<vmem>>, vector<1x4x1xf32>,
    } else {
    }
    %c1_i32_1 = arith.constant 1 : i32
    %4 = arith.cmpi eq, %arg0, %c1_i32_1 : i32
    %5 = arith.extui %4 : i1 to i32
    %c0_i32_2 = arith.constant 0 : i32
    %6 = arith.cmpi ne, %5, %c0_i32_2 : i32
    scf.if %6 {
      %c0 = arith.constant 0 : index
      %c0_4 = arith.constant 0 : index
      %c0_5 = arith.constant 0 : index
      %10 = vector.load %arg9[%c0, %c0_4, %c0_5] : memref<1x4x1xf32, #tpu.memory_space<vmem>>, vector<1x4x1xf32>
      %cst = arith.constant 0.001953125 : f32
      %11 = vector.broadcast %cst : f32 to vector<1x4x1xf32>
      %12 = arith.mulf %10, %11 : vector<1x4x1xf32>
      %13 = arith.index_cast %0 : i32 to index
      %c0_6 = arith.constant 0 : index
      %c0_7 = arith.constant 0 : index
      %14 = vector.load %arg8[%13, %c0_6, %c0_7] : memref<2x4x256xf32, #tpu.memory_space<vmem>>, vector<1x4x256xf32>
      %15 = vector.broadcast %12 : vector<1x4x1xf32> to vector<1x4x256xf32>
      %16 = arith.subf %14, %15 : vector<1x4x256xf32>
      %c0_8 = arith.constant 0 : index
      %c0_9 = arith.constant 0 : index
      %c0_10 = arith.constant 0 : index
      %17 = vector.load %arg10[%c0_8, %c0_9, %c0_10] : memref<1x4x1xf32, #tpu.memory_space<vmem>>, vector<1x4x1xf32>
      %18 = arith.mulf %16, %16 : vector<1x4x256xf32>
      %cst_11 = arith.constant dense<0.000000e+00> : vector<1x4xf32>
      %19 = vector.multi_reduction <add>, %18, %cst_11 [2] : vector<1x4x256xf32> to vector<1x4xf32>
      %20 = vector.shape_cast %19 : vector<1x4xf32> to vector<1x4x1xf32>
      %cst_12 = arith.constant dense<0.000000e+00> : vector<4x1xf32>
      %21 = vector.multi_reduction <add>, %20, %cst_12 [0] : vector<1x4x1xf32> to vector<4x1xf32>
      %22 = vector.shape_cast %21 : vector<4x1xf32> to vector<1x4x1xf32>
      %23 = arith.addf %17, %22 : vector<1x4x1xf32>
      %c0_13 = arith.constant 0 : index
      %c0_14 = arith.constant 0 : index
      %c0_15 = arith.constant 0 : index
      %24 = vector.load %arg10[%c0_13, %c0_14, %c0_15] : memref<1x4x1xf32, #tpu.memory_space<vmem>>, vector<1x4x1xf32>
      tpu.vector_store %arg10[%c0_13, %c0_14, %c0_15], %23 {strides = array<i32>} : memref<1x4x1xf32, #tpu.memory_space<vmem>>, vector<1x4x1xf32>,
    } else {
    }
    %c2_i32 = arith.constant 2 : i32
    %7 = arith.cmpi eq, %arg0, %c2_i32 : i32
    %8 = arith.extui %7 : i1 to i32
    %c0_i32_3 = arith.constant 0 : i32
    %9 = arith.cmpi ne, %8, %c0_i32_3 : i32
    scf.if %9 {
      %c0_i32_4 = arith.constant 0 : i32
      %10 = arith.cmpi eq, %arg1, %c0_i32_4 : i32
      %11 = arith.extui %10 : i1 to i32
      %c0_i32_5 = arith.constant 0 : i32
      %12 = arith.cmpi ne, %11, %c0_i32_5 : i32
      scf.if %12 {
        %c0_17 = arith.constant 0 : index
        %c0_18 = arith.constant 0 : index
        %c0_19 = arith.constant 0 : index
        %27 = vector.load %arg9[%c0_17, %c0_18, %c0_19] : memref<1x4x1xf32, #tpu.memory_space<vmem>>, vector<1x4x1xf32>
        %cst_20 = arith.constant 0.001953125 : f32
        %28 = vector.broadcast %cst_20 : f32 to vector<1x4x1xf32>
        %29 = arith.mulf %27, %28 : vector<1x4x1xf32>
        %c0_21 = arith.constant 0 : index
        %c0_22 = arith.constant 0 : index
        %c0_23 = arith.constant 0 : index
        %30 = vector.load %arg10[%c0_21, %c0_22, %c0_23] : memref<1x4x1xf32, #tpu.memory_space<vmem>>, vector<1x4x1xf32>
        %cst_24 = arith.constant 0.001953125 : f32
        %31 = vector.broadcast %cst_24 : f32 to vector<1x4x1xf32>
        %32 = arith.mulf %30, %31 : vector<1x4x1xf32>
        %c0_25 = arith.constant 0 : index
        %c0_26 = arith.constant 0 : index
        %c0_27 = arith.constant 0 : index
        %33 = vector.load %arg3[%c0_25, %c0_26, %c0_27] : memref<1x4x1xf32, #tpu.memory_space<vmem>>, vector<1x4x1xf32>
        %cst_28 = arith.constant 9.99999974E-6 : f32
        %34 = vector.broadcast %cst_28 : f32 to vector<1x4x1xf32>
        %35 = arith.addf %32, %34 : vector<1x4x1xf32>
        %36 = math.rsqrt %35 : vector<1x4x1xf32>
        %37 = arith.mulf %33, %36 : vector<1x4x1xf32>
        %c0_29 = arith.constant 0 : index
        %c0_30 = arith.constant 0 : index
        %c0_31 = arith.constant 0 : index
        %38 = vector.load %arg11[%c0_29, %c0_30, %c0_31] : memref<1x4x1xf32, #tpu.memory_space<vmem>>, vector<1x4x1xf32>
        tpu.vector_store %arg11[%c0_29, %c0_30, %c0_31], %37 {strides = array<i32>} : memref<1x4x1xf32, #tpu.memory_space<vmem>>, vector<1x4x1xf32>,
        %c0_32 = arith.constant 0 : index
        %c0_33 = arith.constant 0 : index
        %c0_34 = arith.constant 0 : index
        %39 = vector.load %arg4[%c0_32, %c0_33, %c0_34] : memref<1x4x1xf32, #tpu.memory_space<vmem>>, vector<1x4x1xf32>
        %40 = arith.mulf %29, %37 : vector<1x4x1xf32>
        %41 = arith.subf %39, %40 : vector<1x4x1xf32>
        %c0_35 = arith.constant 0 : index
        %c0_36 = arith.constant 0 : index
        %c0_37 = arith.constant 0 : index
        %42 = vector.load %arg12[%c0_35, %c0_36, %c0_37] : memref<1x4x1xf32, #tpu.memory_space<vmem>>, vector<1x4x1xf32>
        tpu.vector_store %arg12[%c0_35, %c0_36, %c0_37], %41 {strides = array<i32>} : memref<1x4x1xf32, #tpu.memory_space<vmem>>, vector<1x4x1xf32>,
        %c0_38 = arith.constant 0 : index
        %c0_39 = arith.constant 0 : index
        %c0_40 = arith.constant 0 : index
        %43 = vector.load %arg6[%c0_38, %c0_39, %c0_40] : memref<1x4x1xf32, #tpu.memory_space<vmem>>, vector<1x4x1xf32>
        tpu.vector_store %arg6[%c0_38, %c0_39, %c0_40], %29 {strides = array<i32>} : memref<1x4x1xf32, #tpu.memory_space<vmem>>, vector<1x4x1xf32>,
        %c0_41 = arith.constant 0 : index
        %c0_42 = arith.constant 0 : index
        %c0_43 = arith.constant 0 : index
        %44 = vector.load %arg7[%c0_41, %c0_42, %c0_43] : memref<1x4x1xf32, #tpu.memory_space<vmem>>, vector<1x4x1xf32>
        tpu.vector_store %arg7[%c0_41, %c0_42, %c0_43], %32 {strides = array<i32>} : memref<1x4x1xf32, #tpu.memory_space<vmem>>, vector<1x4x1xf32>,
      } else {
      }
      %13 = arith.index_cast %0 : i32 to index
      %c0 = arith.constant 0 : index
      %c0_6 = arith.constant 0 : index
      %14 = vector.load %arg8[%13, %c0, %c0_6] : memref<2x4x256xf32, #tpu.memory_space<vmem>>, vector<1x4x256xf32>
      %c0_7 = arith.constant 0 : index
      %c0_8 = arith.constant 0 : index
      %c0_9 = arith.constant 0 : index
      %15 = vector.load %arg11[%c0_7, %c0_8, %c0_9] : memref<1x4x1xf32, #tpu.memory_space<vmem>>, vector<1x4x1xf32>
      %16 = vector.broadcast %15 : vector<1x4x1xf32> to vector<1x4x256xf32>
      %17 = arith.mulf %14, %16 : vector<1x4x256xf32>
      %c0_10 = arith.constant 0 : index
      %c0_11 = arith.constant 0 : index
      %c0_12 = arith.constant 0 : index
      %18 = vector.load %arg12[%c0_10, %c0_11, %c0_12] : memref<1x4x1xf32, #tpu.memory_space<vmem>>, vector<1x4x1xf32>
      %19 = vector.broadcast %18 : vector<1x4x1xf32> to vector<1x4x256xf32>
      %20 = arith.addf %17, %19 : vector<1x4x256xf32>
      %cst = arith.constant 0.000000e+00 : f32
      %21 = vector.broadcast %cst : f32 to vector<1x4x256xf32>
      %22 = arith.cmpf oge, %20, %21 : vector<1x4x256xf32>
      %cst_13 = arith.constant 0.00999999977 : f32
      %23 = vector.broadcast %cst_13 : f32 to vector<1x4x256xf32>
      %24 = arith.mulf %20, %23 : vector<1x4x256xf32>
      %25 = arith.select %22, %20, %24 : vector<1x4x256xi1>, vector<1x4x256xf32>
      %c0_14 = arith.constant 0 : index
      %c0_15 = arith.constant 0 : index
      %c0_16 = arith.constant 0 : index
      %26 = vector.load %arg5[%c0_14, %c0_15, %c0_16] : memref<1x4x256xf32, #tpu.memory_space<vmem>>, vector<1x4x256xf32>
      tpu.vector_store %arg5[%c0_14, %c0_15, %c0_16], %25 {strides = array<i32>} : memref<1x4x256xf32, #tpu.memory_space<vmem>>, vector<1x4x256xf32>,
    } else {
    }
    return
  }
  func.func @transform_0(%arg0: i32, %arg1: i32) -> (i32, i32, i32) {
    %c0_i32 = arith.constant 0 : i32
    %0 = arith.cmpi eq, %arg0, %c0_i32 : i32
    %c1_i32 = arith.constant 1 : i32
    %1 = arith.select %0, %arg1, %c1_i32 : i32
    %c0_i32_0 = arith.constant 0 : i32
    %c0_i32_1 = arith.constant 0 : i32
    %c0_i32_2 = arith.constant 0 : i32
    return %1, %c0_i32_0, %c0_i32_1 : i32, i32, i32
  }
  func.func @transform_1(%arg0: i32, %arg1: i32) -> (i32, i32, i32) {
    %c0_i32 = arith.constant 0 : i32
    %c0_i32_0 = arith.constant 0 : i32
    %c0_i32_1 = arith.constant 0 : i32
    %c0_i32_2 = arith.constant 0 : i32
    return %c0_i32, %c0_i32_0, %c0_i32_1 : i32, i32, i32
  }
  func.func @transform_2(%arg0: i32, %arg1: i32) -> (i32, i32, i32) {
    %c0_i32 = arith.constant 0 : i32
    %c0_i32_0 = arith.constant 0 : i32
    %c0_i32_1 = arith.constant 0 : i32
    %c0_i32_2 = arith.constant 0 : i32
    return %c0_i32, %c0_i32_0, %c0_i32_1 : i32, i32, i32
  }
  func.func @transform_3(%arg0: i32, %arg1: i32) -> (i32, i32, i32) {
    %c2_i32 = arith.constant 2 : i32
    %0 = arith.cmpi eq, %arg0, %c2_i32 : i32
    %c0_i32 = arith.constant 0 : i32
    %1 = arith.select %0, %arg1, %c0_i32 : i32
    %c0_i32_0 = arith.constant 0 : i32
    %c0_i32_1 = arith.constant 0 : i32
    %c0_i32_2 = arith.constant 0 : i32
    return %1, %c0_i32_0, %c0_i32_1 : i32, i32, i32
  }
  func.func @transform_4(%arg0: i32, %arg1: i32) -> (i32, i32, i32) {
    %c0_i32 = arith.constant 0 : i32
    %c0_i32_0 = arith.constant 0 : i32
    %c0_i32_1 = arith.constant 0 : i32
    %c0_i32_2 = arith.constant 0 : i32
    return %c0_i32, %c0_i32_0, %c0_i32_1 : i32, i32, i32
  }
  func.func @transform_5(%arg0: i32, %arg1: i32) -> (i32, i32, i32) {
    %c0_i32 = arith.constant 0 : i32
    %c0_i32_0 = arith.constant 0 : i32
    %c0_i32_1 = arith.constant 0 : i32
    %c0_i32_2 = arith.constant 0 : i32
    return %c0_i32, %c0_i32_0, %c0_i32_1 : i32, i32, i32
  }
}

</mosaic_0001>

<bundles_post_ra>
// kernel: tpu_custom_call.1
= control target key start
LH: loop header
LB: loop body
LE: loop exit
PB: predicated region body
PF: predicated region fallthrough
CT: control target
= control target key end

     0   :  { %11 = vsyncpa [#allocation8], 0  ;;  %s1056_s0 = inlined_call_operand.hbm [shape: f32[2,4,256], index: 0, kind: input, shape index: {}]   ;;  %s1057_s1 = inlined_call_operand.vmem [shape: f32[1,4,1], index: 1, kind: input, shape index: {}]   ;;  %s1058_s2 = inlined_call_operand.vmem [shape: f32[1,4,1], index: 2, kind: input, shape index: {}]   ;;  %s1059_s3 = inlined_call_operand.hbm [shape: f32[2,4,256], index: 3, kind: output, shape index: {0}]   ;;  %s1060_s4 = inlined_call_operand.vmem [shape: f32[1,4,1], index: 4, kind: output, shape index: {1}]   ;;  %s1061_s5 = inlined_call_operand.vmem [shape: f32[1,4,1], index: 5, kind: output, shape index: {2}]  }
   0x1   :  { %13 = vsyncpa [#allocation8 + $0x1], 0 }
   0x2   :  { %14 = vsyncpa [#allocation9], 0 }
   0x3   :  { %16 = vsyncpa [#allocation9 + $0x1], 0  ;;  %s836_s18 = smov 0   ;;  %s838_s19 = smov 0  }
   0x4   :  { %s840_s20 = smov 0   ;;  %s842_s21 = smov 0  }
   0x5   :  { %s844_s22 = smov 0   ;;  %s846_s23 = smov 0  }
   0x6   :  { %s848_s24 = smov 0   ;;  %s850_s25 = smov 0  }
   0x7   :  { %s852_s26 = smov 0   ;;  %s854_s27 = smov 0  }
   0x8   :  { %s856_s28 = smov 0  }
   0x9 LB: > { %1066 = sst [smem:[#allocation13_spill]] %s789_s26  ;;  %s506_s29 = sadd.s32 4294967295, %s797_s28   ;;  %s797_s28 = sphi %s856_s28, %s22_s28   ;;  %s793_s27 = sphi %s854_s27, %s1089_s27   ;;  %s789_s26 = sphi %s852_s26, %s1081_s26   ;;  %s785_s25 = sphi %s850_s25, %s1080_s25   ;;  %s781_s24 = sphi %s848_s24, %s1079_s24   ;;  %s777_s23 = sphi %s846_s23, %s1088_s23   ;;  %s773_s22 = sphi %s844_s22, %s1087_s22   ;;  %s769_s21 = sphi %s842_s21, %s1086_s21   ;;  %s765_s20 = sphi %s840_s20, %s1085_s20   ;;  %s761_s19 = sphi %s838_s19, %s1084_s19   ;;  %s757_s18 = sphi %s836_s18, %s1083_s18  }
   0xa   : > { %1067 = sst [smem:[#allocation14_spill]] %s793_s27  ;;  %s31_s6 = sadd.s32 1, %s789_s26 }
   0xb   : > { %s34_s7 = sadd.s32 1, %s793_s27  ;;  %p32_p0 = scmp.ge.s32.totalorder %s31_s6, 2 }
   0xc   : > { %p38_p1 = scmp.eq.s32.totalorder %s793_s27, 0  ;;  %s45_s8 = sadd.s32 1, %s777_s23 }
   0xd   : > { %p52_p2 = scmp.ne.s32.totalorder %s777_s23, %s773_s22  ;;  %s1091_s6 = smov (%p32_p0, %s31_s6), 0 }
   0xe   : > { %1068 = sst [smem:[#allocation15_spill]] %s1091_s6  ;;  %s1093_s7 = smov (!%p32_p0, %s34_s7), %s793_s27 }
   0xf   : > { %s901_s9 = scalar_select %p38_p1, %s789_s26, 1 }
  0x10   : > { %p36_p3 = scmp.ge.s32.totalorder %s1093_s7, 3  ;;  %p53_p4 = scmp.eq.s32.totalorder %s797_s28, 0 }
  0x11   : > { %p58_p5 = scmp.ne.s32.totalorder %s773_s22, %s769_s21  ;;  %p59_p6 = scmp.eq.s32.totalorder %s506_s29, 0 }
  0x12   : > { %s1095_s7 = smov (%p36_p3, %s1093_s7), 0  ;;  %p907_p7 = por %p53_p4, %p52_p2 }
  0x13   : > { %1069 = sst [smem:[#allocation16_spill]] %s1095_s7  ;;  %p911_p8 = por %p59_p6, %p58_p5 }
  0x14   : > { %p40_p9 = scmp.eq.s32.totalorder %s1095_s7, 0  ;;  %p110_p10 = scmp.eq.s32.totalorder %s793_s27, 2 }
  0x15   : > { %p112_p11 = scmp.eq.s32.totalorder %s1095_s7, 2  ;;  %s117_s12 = sadd.s32 1, %s765_s20 }
  0x16   : > { %s41_s13 = scalar_select %p40_p9, %s1091_s6, 1 }
  0x17   : > { %s111_s14 = scalar_select %p110_p10, %s789_s26, 0 }
  0x18   : > { %s42_s15 = ssub.s32 %s901_s9, %s41_s13  ;;  %p127_p12 = scmp.ne.s32.totalorder %s765_s20, %s761_s19 }
  0x19   : > { %p43_p13 = scmp.eq.s32.totalorder %s42_s15, 0  ;;  %p128_p0 = scmp.eq.s32.totalorder %s506_s29, 5 }
  0x1a   : > { %s113_s16 = scalar_select %p112_p11, %s1091_s6, 0 }
  0x1b   : > { %s926_s17 = scalar_select %p43_p13, %s777_s23, %s45_s8  }
  0x1c   : > { %s114_s21 = ssub.s32 %s111_s14, %s113_s16  ;;  %p928_p1 = por %p128_p0, %p127_p12 }
  0x1d   : > { %1072 = sst [smem:[#allocation17_spill]] %s926_s17  ;;  %p115_p2 = scmp.eq.s32.totalorder %s114_s21, 0 }
  0x1e   : > { %p133_p3 = scmp.ne.s32.totalorder %s761_s19, %s757_s18  ;;  %s1074_s7 = sadd.s32 4294967294, %s797_s28  }
  0x1f   : > { %p134_p4 = scmp.eq.s32.totalorder %s1074_s7, 5  ;;  %p549_p6 = scmp.lt.s32.totalorder %s797_s28, 6 }
  0x20   : > { %s937_s27 = scalar_select %p115_p2, %s765_s20, %s117_s12  }
  0x21   : > { %p939_p5 = por %p134_p4, %p133_p3  ;;  %s202_s29 = sand.u32 1, %s777_s23  }
  0x22   : > { %s532_s8 = sshll.u32 %s901_s9, 7  ;;  %s510_s14 = sshll.u32 %s202_s29, 3 }
  0x23   : > { %s1075_s13 = scalar_select %p939_p5, 1, 0 }
  0x24   : > { %s214_s6 = scalar_lea.hbm %s1056_s0, %s532_s8  ;;  %s206_s26 = scalar_lea.vmem [#allocation7], %s510_s14 }
  0x25   : > { %s216_s17 = sshll.u32 %s206_s26, 4  ;;  %p951_p9 = pnand %p549_p6, %p907_p7  ;;  %s217_s17 = int_to_ptr.vmem [resolvable:$true] %s216_s17 }
  0x26   : > { %p513_p10 = scmp.ge.s32.totalorder %s797_s28, 1  ;;  %p221_p11 = scmp.lt.s32.totalorder %s797_s28, 7 }
  0x27   : > { %s203_s7 = scalar_lea.sflag [#allocation8], %s202_s29  ;;  %p651_p12 = pneg %p951_p9 }
  0x28   : > { %s662_s9 = scalar_lea.vmem %s217_s17, 128  ;;  %s799_s12 = smov [#allocation7]  }
  0x29   : > { %p663_p13 = scmp.ne.s32.totalorder %s217_s17, %s662_s9  ;;  %s667_s8 = sshll.u32 %s799_s12, 4  ;;  %s668_s8 = int_to_ptr.vmem [resolvable:$false] %s667_s8 }
  0x2a   : > { %s669_s26 = scalar_lea.vmem %s668_s8, 256  ;;  %p670_p3 = scmp.lt.s32.totalorder %s217_s17, %s668_s8 }
  0x2b   : > { %p665_p0 = pnand %p663_p13, %p651_p12  ;;  %p671_p7 = scmp.lt.s32.totalorder %s669_s26, %s662_s9 }
  0x2d   : > { %p666_p2 = pneg %p665_p0  ;;  %p672_p4 = por %p671_p7, %p670_p3 }
  0x2f   : > { %p673_p6 = pnand %p672_p4, %p666_p2 }
  0x31   : > { %676 = shalt.err (!%p673_p6)
}
  0x32   : > { %544 = dma.hbm_to_vmem [thread:$0]  (!%p951_p9), %s214_s6, 128, %s217_s17, %s203_s7  }
  0x33   : > { %p222_p5 = pnand %p513_p10, %p221_p11 }
  0x34   : > { %s227_s10 = sand.u32 (!%p222_p5), 1, %s773_s22  }
  0x35   : > { %225 = sbr.rel (%p222_p5) target bundleno = 708 (0x2c4), region = 32  ;;  %s514_s29 = sshll.u32 (!%p222_p5), %s227_s10, 3 }
  0x36   : > { %s228_s14 = scalar_lea.sflag (!%p222_p5), [#allocation8], %s227_s10  ;;  %s231_s15 = scalar_lea.vmem (!%p222_p5), [#allocation7], %s514_s29 }
  0x3a   : > { %748 = dma.done.wait (%p911_p8), %s228_s14, 128  }
  0x3b   : > { %750 = vsyncadd (%p911_p8), %s228_s14, 4294967168  ;;  %s251_s16 = sand.u32 1, %s761_s19   ;;  %p516_p5 = scmp.ne.s32.totalorder %s785_s25, 0 }
  0x3c   : > { %s973_s6 = sshll.u32 %s251_s16, 3  ;;  %p517_p9 = scmp.ne.s32.totalorder (!%p516_p5), %s781_s24, 0 }
  0x3d   : > { %s253_s17 = scalar_lea.vmem [#allocation10], %s973_s6  ;;  %265 = sbr.rel (%p516_p5) target bundleno = 220 (0xdc), region = 40 }
  0x42   : > { %269 = sbr.rel (%p517_p9) target bundleno = 73 (0x49), region = 44 }
  0x47   : > { %vm270_vm0 = vcmask 3072   ;;  %v800_v0 = vmov 0.0  }
  0x48   : > { %271 = vst.msk [vmem:[#allocation3] sm:$0xf] %vm270_vm0, %v800_v0  ;;  %272 = vst.msk [vmem:[#allocation4] sm:$0xf] %vm270_vm0, %v800_v0 }
  0x49 PF: > { %v273_v1 = vld [vmem:[%s231_s15] sm:$0xff]  ;;  %s533_s11 = sshll.u32 %s781_s24, 3  ;;  %vm282_vm1 = vcmask 1043456   ;;  %vm290_vm2 = vcmask 3072  }
  0x4a   : > { %v280_v2 = vcombine.high %v273_v1, %v273_v1  ;;  %v283_v3 = vsel %vm282_vm1, %v273_v1, 0.0  ;;  %s276_s21 = scalar_lea.vmem [#allocation2], %s533_s11 }
  0x4b   : > { %277 = vst [vmem:[%s276_s21] sm:$0xff] %v273_v1 }
  0x4c   : > { %v284_v4 = vsel %vm282_vm1, %v280_v2, 0.0 }
  0x4d   : > { %v285_v5 = vadd.f32 %v284_v4, %v283_v3 }
  0x4f   : > { %286 = vadd.xlane.f32.xlu0 %v285_v5  ;;  %v278_v6 = vld [vmem:[#allocation3] sm:$0xf] }
  0xd8   : > { %v287_v7 = vpop.xlane.xlu0 %286 }
  0xd9   : > { %v289_v8 = vadd.f32 %v287_v7, %v278_v6 }
  0xdb   : > { %291 = vst.msk [vmem:[#allocation3] sm:$0xf] %vm290_vm2, %v289_v8 }
  0xdc PF: > { %p520_p8 = scmp.ne.s32.totalorder %s785_s25, 1 }
  0xdd   : > { %s534_s7 = sshll.u32 (!%p520_p8), %s781_s24, 3 }
  0xde   : > { %295 = sbr.rel (%p520_p8) target bundleno = 506 (0x1fa), region = 48  ;;  %s300_s9 = scalar_lea.vmem (!%p520_p8), [#allocation2], %s534_s7 }
  0xe3   : > { %v296_v9 = vld [vmem:[#allocation3] sm:$0xf]  ;;  %v801_v10 = vmov 0   ;;  %v802_v12 = vmov 839922192   ;;  %v309_v14 = vlaneseq  ;;  %v301_v18 = vld [vmem:[%s300_s9] sm:$0xff] }
  0xe4   : > { %645 = vset.pattern.permute.xlu0 %v801_v10  ;;  %v297_v11 = vmul.f32 0.001953125, %v296_v9  ;;  %v307_v13 = vunpack.c.l.s4 %v802_v12  ;;  %vm320_vm3 = vcmask 1043456   ;;  %v315_v27 = vld [vmem:[#allocation4] sm:$0xf]  ;;  %vm328_vm4 = vcmask 3072  }
  0xe5   : > { %v310_v16 = vshrl.u32 %v309_v14, 7 }
  0xe6   : > { %304 = vperm.xlu0 %645, %v297_v11   ;;  %v308_v15 = vunpack.c.0.s8 %v307_v13 }
  0xe8   : > { %v311_v17 = vsub.s32 %v308_v15, %v310_v16 }
 0x161   : > { %v305_v19 = vpop.permute.xlu0 %304 }
 0x162   : > { %v312_v20 = vrot.slane %v305_v19, %v311_v17 }
 0x164   : > { %v314_v21 = vsub.f32 %v301_v18, %v312_v20 }
 0x166   : > { %v316_v22 = vmul.f32 %v314_v21, %v314_v21 }
 0x168   : > { %v318_v23 = vcombine.high %v316_v22, %v316_v22  ;;  %v321_v24 = vsel %vm320_vm3, %v316_v22, 0.0 }
 0x16a   : > { %v322_v25 = vsel %vm320_vm3, %v318_v23, 0.0 }
 0x16b   : > { %v323_v26 = vadd.f32 %v322_v25, %v321_v24 }
 0x16d   : > { %324 = vadd.xlane.f32.xlu0 %v323_v26 }
 0x1f6   : > { %v325_v28 = vpop.xlane.xlu0 %324 }
 0x1f7   : > { %v327_v29 = vadd.f32 %v325_v28, %v315_v27 }
 0x1f9   : > { %329 = vst.msk [vmem:[#allocation4] sm:$0xf] %vm328_vm4, %v327_v29 }
 0x1fa PF: > { %p523_p10 = scmp.ne.s32.totalorder %s785_s25, 2 }
 0x1fb   : > { %p524_p11 = scmp.ne.s32.totalorder (!%p523_p10), %s781_s24, 0 }
 0x1fc   : > { %333 = sbr.rel (%p523_p10) target bundleno = 683 (0x2ab), region = 52 }
 0x201   : > { %337 = sbr.rel (%p524_p11) target bundleno = 544 (0x220), region = 56 }
 0x206   : > { %v340_v30 = vld [vmem:[#allocation4] sm:$0xf]  ;;  %vm346_vm5 = vcmask 3072   ;;  %v338_v32 = vld [vmem:[#allocation3] sm:$0xf] }
 0x207   : > { %v341_v31 = vmul.f32 0.001953125, %v340_v30  ;;  %v339_v33 = vmul.f32 0.001953125, %v338_v32  ;;  %v342_v35 = vld [vmem:[%s1057_s1] sm:$0xf] }
 0x208   : > { %v348_v38 = vld [vmem:[%s1058_s2] sm:$0xf] }
 0x209   : > { %v343_v34 = vadd.f32 1e-05, %v341_v31  ;;  %353 = vst.msk [vmem:[%s1061_s5] sm:$0xf] %vm346_vm5, %v341_v31  ;;  %352 = vst.msk [vmem:[%s1060_s4] sm:$0xf] %vm346_vm5, %v339_v33 }
 0x20b   : > { %646 = vrsqrt.f32 %v343_v34 }
 0x218   : > { %v647_v36 = vpop.eup %646 }
 0x219   : > { %v345_v37 = vmul.f32 %v647_v36, %v342_v35 }
 0x21b   : > { %347 = vst.msk [vmem:[#allocation5] sm:$0xf] %vm346_vm5, %v345_v37  ;;  %v349_v39 = vmul.f32 %v345_v37, %v339_v33 }
 0x21d   : > { %v350_v40 = vsub.f32 %v348_v38, %v349_v39 }
 0x21f   : > { %351 = vst.msk [vmem:[#allocation6] sm:$0xf] %vm346_vm5, %v350_v40 }
 0x220 PF: > { %v803_v42 = vmov 0   ;;  %v804_v44 = vmov 839922192   ;;  %v366_v46 = vlaneseq  ;;  %s535_s21 = sshll.u32 %s781_s24, 3 }
 0x221   : > { %648 = vset.pattern.permute.xlu0 %v803_v42  ;;  %v364_v45 = vunpack.c.l.s4 %v804_v44  ;;  %s356_s7 = scalar_lea.vmem [#allocation2], %s535_s21 }
 0x222   : > { %v358_v41 = vld [vmem:[#allocation5] sm:$0xf]  ;;  %v367_v48 = vshrl.u32 %v366_v46, 7  ;;  %v357_v52 = vld [vmem:[%s356_s7] sm:$0xff] }
 0x223   : > { %361 = vperm.xlu0 %648, %v358_v41   ;;  %v365_v47 = vunpack.c.0.s8 %v364_v45 }
 0x225   : > { %v368_v49 = vsub.s32 %v365_v47, %v367_v48 }
 0x226   : > { %v372_v43 = vld [vmem:[#allocation6] sm:$0xf] }
 0x227   : > { %375 = vperm.xlu0 %648, %v372_v43  }
 0x29e   : > { %v362_v50 = vpop.permute.xlu0 %361 }
 0x29f   : > { %v369_v51 = vrot.slane %v362_v50, %v368_v49 }
 0x2a1   : > { %v371_v54 = vmul.f32 %v369_v51, %v357_v52 }
 0x2a2   : > { %v376_v53 = vpop.permute.xlu0 %375 }
 0x2a3   : > { %v383_v55 = vrot.slane %v376_v53, %v368_v49 }
 0x2a5   : > { %v385_v56 = vadd.f32 %v383_v55, %v371_v54 }
 0x2a7   : > { %vm386_vm6 = vcmp.ge.f32.partialorder %v385_v56, 0.0  ;;  %v387_v57 = vmul.f32 0.01, %v385_v56 }
 0x2a9   : > { %v388_v58 = vsel %vm386_vm6, %v385_v56, %v387_v57 }
 0x2aa   : > { %389 = vst [vmem:[%s253_s17] sm:$0xff] %v388_v58 }
 0x2ab PF: > { %p398_p12 = scmp.eq.s32.totalorder %s785_s25, 2  ;;  %s407_s9 = sshll.u32 %s253_s17, 4  ;;  %s408_s9 = int_to_ptr.vmem [resolvable:$true] %s407_s9 }
 0x2ac   : > { %s391_s29 = scalar_lea.sflag [#allocation9], %s251_s16  ;;  %s677_s14 = scalar_lea.vmem %s408_s9, 128 }
 0x2ad   : > { %s1097_s24 = smov (!%p398_p12, %s781_s24), 0  ;;  %p678_p13 = scmp.ne.s32.totalorder %s408_s9, %s677_s14 }
 0x2ae   : > { %s536_s12 = sshll.u32 %s1097_s24, 7  ;;  %s805_s15 = smov [#allocation10]  }
 0x2af   : > { %s405_s10 = scalar_lea.hbm %s1059_s3, %s536_s12  ;;  %p679_p0 = pnand %p678_p13, %p928_p1 }
 0x2b0   : > { %s681_s11 = sshll.u32 %s805_s15, 4  ;;  %s682_s11 = int_to_ptr.vmem [resolvable:$false] %s681_s11 }
 0x2b1   : > { %p680_p2 = pneg %p679_p0  ;;  %s683_s25 = scalar_lea.vmem %s682_s11, 256 }
 0x2b2   : > { %p684_p3 = scmp.lt.s32.totalorder %s408_s9, %s682_s11  ;;  %p685_p7 = scmp.lt.s32.totalorder %s683_s25, %s677_s14 }
 0x2b4   : > { %p686_p4 = por %p685_p7, %p684_p3 }
 0x2b6   : > { %p687_p6 = pnand %p686_p4, %p680_p2 }
 0x2b8   : > { %690 = shalt.err (!%p687_p6)
}
 0x2b9   : > { %s691_s24 = scalar_lea.hbm %s405_s10, 128  ;;  %s695_s17 = scalar_lea.hbm %s1059_s3, 256 }
 0x2ba   : > { %p692_p5 = scmp.ne.s32.totalorder %s405_s10, %s691_s24  ;;  %p696_p10 = scmp.lt.s32.totalorder %s405_s10, %s1059_s3 }
 0x2bb   : > { %p697_p11 = scmp.lt.s32.totalorder %s695_s17, %s691_s24 }
 0x2bc   : > { %p693_p9 = pnand %p692_p5, %p928_p1 }
 0x2bd   : > { %p698_p12 = por %p697_p11, %p696_p10 }
 0x2be   : > { %p694_p8 = pneg %p693_p9 }
 0x2c0   : > { %p699_p13 = pnand %p698_p12, %p694_p8 }
 0x2c2   : > { %702 = shalt.err (!%p699_p13)
}
 0x2c3   : > { %539 = dma.vmem_to_hbm [thread:$0]  (%p928_p1), %s408_s9, 128, %s405_s10, %s391_s29  }
 0x2c4 PF: > { %p550_p0 = scmp.ge.s32.totalorder %s797_s28, 2  ;;  %s431_s12 = sand.u32 1, %s757_s18  }
 0x2c5   : > { %p1077_p2 = scmp.ne.s32.totalorder %s1075_s13, 0  ;;  %s432_s8 = scalar_lea.sflag [#allocation9], %s431_s12 }
 0x2c7   : > { %p546_p3 = pnand %p550_p0, %p1077_p2 }
 0x2c9   : > { %p547_p7 = pneg %p546_p3 }
 0x2cb   : > { %752 = dma.done.wait (%p547_p7), %s432_s8, 128  }
 0x2cc   : > { %754 = vsyncadd (%p547_p7), %s432_s8, 4294967168  ;;  %s22_s28 = sadd.s32 1, %s797_s28   ;;  %s1078_s30 = sld [smem:[#allocation17_spill]] }
 0x2cd   : > { %p19_p4 = scmp.ge.s32.totalorder %s22_s28, 8   ;;  %s1079_s24 = sld [smem:[#allocation13_spill]] }
 0x2ce   : > { %s1080_s25 = sld [smem:[#allocation14_spill]]  ;;  %s1083_s18 = smov %s761_s19 }
 0x2cf   : > { %s1081_s26 = sld [smem:[#allocation15_spill]]  ;;  %s1084_s19 = smov %s765_s20 }
 0x2d0   : > { %s1082_s9 = sld [smem:[#allocation16_spill]]  ;;  %s1085_s20 = smov %s937_s27 }
 0x2d1   : > { %s1086_s21 = smov %s773_s22  ;;  %s1087_s22 = smov %s777_s23 }
 0x2d2   : > { %s1088_s23 = smov %s1078_s30  ;;  %21 = sbr.rel (!%p19_p4) target bundleno = 9 (0x9), region = 116 }
 0x2d6   : > { %s1089_s27 = smov %s1082_s9 }
 0x2d7   :  { %437 = vsyncpa [#allocation8], 1 }
 0x2d8   :  { %439 = vsyncpa [#allocation8 + $0x1], 1 }
 0x2d9   :  { %440 = vsyncpa [#allocation9], 1 }
 0x2da   :  { %442 = vsyncpa [#allocation9 + $0x1], 1 }

</bundles_post_ra>
